<compile_context>
chip_gen: v5e
topology: v5e:2x2
jax: 0.10.0
libtpu: 0.0.40
codegen_flags: <defaults>
</compile_context>

<pallas_src>
import functools

import jax
import jax.numpy as jnp
from jax.experimental import pallas as pl
from jax.experimental.pallas import tpu as pltpu


def _round_up(x, m):
    return ((x + m - 1) // m) * m


def _padded_bytes(shape, itemsize):
    """VMEM bytes of a block after (8, 128) sublane/lane padding."""
    shape = (1,) * max(0, 2 - len(shape)) + tuple(shape)
    lead = 1
    for d in shape[:-2]:
        lead *= d
    return lead * _round_up(shape[-2], 8) * _round_up(shape[-1], 128) * itemsize


def _choose_tiling(B, block_b):
    """Sublane-aligned batch tile; prefer an even >=2-block grid (v7x: 2 TCs)."""
    bp = _round_up(B, 8)
    if bp <= 16:
        return bp, 1                         # too small to shard across cores
    tb = min(max(8, (block_b // 8) * 8), _round_up(pl.cdiv(bp, 2), 8))
    nb = pl.cdiv(bp, tb)
    if nb % 2 == 1 and nb > 1:
        nb += 1                              # even block count -> both TCs busy
        tb = _round_up(pl.cdiv(bp, nb), 8)
        nb = pl.cdiv(bp, tb)
    return tb, nb


def _mlp_policy_kernel(
    obs_ref,             # [TB, N*Dobs] f32 (lane-dense; cast to bf16 in-kernel)
    w_enc_bd, b_enc_bd,  # [N*Dobs, N*E] bf16 block-diag, [1, N*E] f32 (1/N folded)
    w1, b1,              # [E, H]  bf16, [1, H] f32
    w2, b2,              # [H, H]  bf16, [1, H] f32
    w_head, b_head,      # [H, OUT_PAD] bf16, [1, OUT_PAD] f32 (mean ++ attack ++ pad)
    out_ref,             # [TB, OUT_PAD] bf16 — lane-dense fused head output
    *, n_entities, embed_dim,
):
    # ---- ObsEncoder as ONE block-diagonal MXU matmul (contraction K = N*Dobs) ----
    x = obs_ref[...].astype(jnp.bfloat16)                      # in-kernel cast
    h = jnp.dot(x, w_enc_bd[...], preferred_element_type=jnp.float32)
    h = jnp.maximum(h + b_enc_bd[...], 0.0)                    # [TB, N*E] f32
    # Entity pool: 1/N was folded into the encoder weights, so a plain sum of
    # N static E-lane slices implements the mean-pool.
    emb = h[:, :embed_dim]
    for i in range(1, n_entities):
        emb = emb + h[:, i * embed_dim:(i + 1) * embed_dim]    # [TB, E] f32

    # ---- MLP trunk: fc1 -> ReLU -> fc2 -> ReLU (bf16 MXU, f32 accumulate) ----
    t = jnp.dot(emb.astype(jnp.bfloat16), w1[...],
                preferred_element_type=jnp.float32)
    t = jnp.maximum(t + b1[...], 0.0)                          # [TB, H] f32
    t = jnp.dot(t.astype(jnp.bfloat16), w2[...],
                preferred_element_type=jnp.float32)
    t = jnp.maximum(t + b2[...], 0.0)                          # [TB, H] f32

    # ---- fused heads: [mean | attack_logits | pad], one lane-dense bf16 store ----
    out = jnp.dot(t.astype(jnp.bfloat16), w_head[...],
                  preferred_element_type=jnp.float32) + b_head[...]
    out_ref[...] = out.astype(out_ref.dtype)


def mlp_policy_forward(entity_obs, valid_targets_mask, params, *, block_b=2048):
    """entity_obs: [B, N, Dobs] f32; valid_targets_mask: [B, T+1] bool or None."""
    B, N, Dobs = entity_obs.shape
    E = params["w_enc"].shape[1]
    H = params["w1"].shape[1]
    A = params["w_mean"].shape[1]
    T1 = params["w_att"].shape[1]
    ND, NE = N * Dobs, N * E
    OUT_PAD = _round_up(A + T1, 128)          # lane-dense fused-head width

    TB, num_blocks = _choose_tiling(B, block_b)
    Bp = TB * num_blocks

    # Lane-dense obs: [B, N, Dobs] -> [B, N*Dobs]; row-major reshape is free.
    # Keep f32 (cast happens in-kernel).  Pad at most TB-1 trailing rows.
    obs2d = entity_obs.reshape(B, ND)
    if Bp != B:
        obs2d = jnp.pad(obs2d, ((0, Bp - B), (0, 0)))

    bf = jnp.bfloat16
    # ObsEncoder as block-diagonal matmul; fold the 1/N mean-pool into W/b
    # (ReLU(z)/N == ReLU(z/N) for N > 0) so the kernel sum-pools.
    w_enc_bd = jnp.kron(jnp.eye(N, dtype=jnp.float32),
                        params["w_enc"] / N).astype(bf)                # [ND, NE]
    b_enc_bd = jnp.tile(params["b_enc"] / N, (1, N)).astype(jnp.float32)  # [1, NE]
    w1 = params["w1"].astype(bf)
    w2 = params["w2"].astype(bf)
    pad_cols = OUT_PAD - (A + T1)
    w_head = jnp.pad(
        jnp.concatenate([params["w_mean"], params["w_att"]], axis=1),
        ((0, 0), (0, pad_cols))).astype(bf)
    b_head = jnp.pad(
        jnp.concatenate([params["b_mean"], params["b_att"]], axis=1),
        ((0, 0), (0, pad_cols))).astype(jnp.float32)

    # --- padding-aware VMEM budget with a generation-aware cap ---
    obs_tile = _padded_bytes((TB, ND), 4)
    out_tile = _padded_bytes((TB, OUT_PAD), 2)
    wbytes = (_padded_bytes((ND, NE), 2) + _padded_bytes((1, NE), 4)
              + _padded_bytes((E, H), 2) + _padded_bytes((1, H), 4)
              + _padded_bytes((H, H), 2) + _padded_bytes((1, H), 4)
              + _padded_bytes((H, OUT_PAD), 2) + _padded_bytes((1, OUT_PAD), 4))
    scratch = (_padded_bytes((TB, NE), 4) + 2 * _padded_bytes((TB, H), 4)
               + _padded_bytes((TB, OUT_PAD), 4))
    try:  # ~48 MiB on v7x (64 MiB VMEM), ~96 MiB on v5e/v6e (128 MiB)
        cap = int(pltpu.get_tpu_info().vmem_capacity_bytes) * 3 // 4
    except Exception:
        cap = 48 * 1024 * 1024
    vmem_limit = int(min(cap,
                         max(32 << 20,
                             2 * (obs_tile + out_tile + wbytes)
                             + scratch + (8 << 20))))

    flops = 2 * Bp * (ND * NE + E * H + H * H + H * OUT_PAD)
    bytes_accessed = (Bp * ND * 4 + Bp * OUT_PAD * 2
                      + 2 * (ND * NE + E * H + H * H + H * OUT_PAD)
                      + 4 * (NE + 2 * H + OUT_PAD))
    cost = pl.CostEstimate(flops=flops, transcendentals=0,
                           bytes_accessed=bytes_accessed)

    kernel = functools.partial(_mlp_policy_kernel, n_entities=N, embed_dim=E)
    head = pl.pallas_call(
        kernel,
        out_shape=jax.ShapeDtypeStruct((Bp, OUT_PAD), jnp.bfloat16),
        grid=(num_blocks,),
        in_specs=[
            pl.BlockSpec((TB, ND), lambda i: (i, 0)),       # streamed obs tile
            # Weights/biases: constant blocks (index_map -> 0) stay VMEM-resident.
            # TODO(synk): pl.Buffered(1) would drop their 2nd buffer; skipped since
            # the whole weight footprint (~0.2 MiB) is negligible here.
            pl.BlockSpec((ND, NE), lambda i: (0, 0)),
            pl.BlockSpec((1, NE), lambda i: (0, 0)),
            pl.BlockSpec((E, H), lambda i: (0, 0)),
            pl.BlockSpec((1, H), lambda i: (0, 0)),
            pl.BlockSpec((H, H), lambda i: (0, 0)),
            pl.BlockSpec((1, H), lambda i: (0, 0)),
            pl.BlockSpec((H, OUT_PAD), lambda i: (0, 0)),
            pl.BlockSpec((1, OUT_PAD), lambda i: (0, 0)),
        ],
        out_specs=pl.BlockSpec((TB, OUT_PAD), lambda i: (i, 0)),
        compiler_params=pltpu.CompilerParams(
            dimension_semantics=("parallel",),   # batch tiles shard over v7x's 2 TCs
            vmem_limit_bytes=vmem_limit,
        ),
        cost_estimate=cost,
    )(obs2d, w_enc_bd, b_enc_bd, w1, params["b1"], w2, params["b2"],
      w_head, b_head)

    head = head[:B].astype(jnp.float32)          # only 13 real lanes; cheap cast
    mean = head[:, :A]
    logits = head[:, A:A + T1]
    if valid_targets_mask is not None:
        logits = jnp.where(valid_targets_mask, logits, jnp.float32(-1.0e9))
    std = jnp.exp(params["log_std"])             # batch-independent -> wrapper
    return mean, std, logits


def init_params(key, obs_dim, embed_dim, act_dim, num_targets):
    ks = jax.random.split(key, 5)

    def lin(k, fan_in, fan_out):
        kw, kb = jax.random.split(k)
        bound = 1.0 / jnp.sqrt(fan_in)
        w = jax.random.uniform(kw, (fan_in, fan_out), jnp.float32, -bound, bound)
        b = jax.random.uniform(kb, (1, fan_out), jnp.float32, -bound, bound)
        return w, b

    w_enc, b_enc = lin(ks[0], obs_dim, embed_dim)
    w1, b1 = lin(ks[1], embed_dim, 128)
    w2, b2 = lin(ks[2], 128, 128)
    w_mean, b_mean = lin(ks[3], 128, act_dim)
    w_att, b_att = lin(ks[4], 128, num_targets + 1)
    log_std = jnp.zeros((act_dim,), jnp.float32)  # nn.Parameter(torch.zeros(act_dim))

    return dict(
        w_enc=w_enc, b_enc=b_enc, w1=w1, b1=b1, w2=w2, b2=b2,
        w_mean=w_mean, b_mean=b_mean, w_att=w_att, b_att=b_att,
        log_std=log_std,
    )


def reference_forward(entity_obs, valid_targets_mask, p):
    # Pure-JAX reference mirroring the kernel's bf16-operand / f32-accumulate math.
    bf, f32 = jnp.bfloat16, jnp.float32
    h = jnp.einsum("bnd,de->bne", entity_obs.astype(bf), p["w_enc"].astype(bf),
                   preferred_element_type=f32) + p["b_enc"]
    emb = jnp.maximum(h, 0.0).mean(axis=1)
    x = jnp.maximum(jnp.dot(emb.astype(bf), p["w1"].astype(bf),
                            preferred_element_type=f32) + p["b1"], 0.0)
    x = jnp.maximum(jnp.dot(x.astype(bf), p["w2"].astype(bf),
                            preferred_element_type=f32) + p["b2"], 0.0)
    mean = jnp.dot(x.astype(bf), p["w_mean"].astype(bf),
                   preferred_element_type=f32) + p["b_mean"]
    logits = jnp.dot(x.astype(bf), p["w_att"].astype(bf),
                     preferred_element_type=f32) + p["b_att"]
    logits = jnp.where(valid_targets_mask, logits, -1.0e9)
    std = jnp.exp(p["log_std"])
    return mean, std, logits


if __name__ == "__main__":
    B, N_ENT, OBS_DIM = 2, 8, 16
    EMBED_DIM, ACT_DIM, NUM_TARGETS = 32, 4, 8

    key = jax.random.PRNGKey(0)
    k_obs, k_mask, k_par = jax.random.split(key, 3)

    entity_obs = jax.random.normal(k_obs, (B, N_ENT, OBS_DIM), jnp.float32)
    valid_targets_mask = jax.random.bernoulli(
        k_mask, p=0.7, shape=(B, NUM_TARGETS + 1))
    params = init_params(k_par, OBS_DIM, EMBED_DIM, ACT_DIM, NUM_TARGETS)

    mean, std, logits = mlp_policy_forward(entity_obs, valid_targets_mask, params)
    jax.block_until_ready((mean, std, logits))

    r_mean, r_std, r_logits = reference_forward(entity_obs, valid_targets_mask, params)
    assert mean.shape == (B, ACT_DIM)
    assert std.shape == (ACT_DIM,)
    assert logits.shape == (B, NUM_TARGETS + 1)
    assert jnp.allclose(mean, r_mean, atol=2e-2, rtol=2e-2)
    assert jnp.allclose(std, r_std, atol=1e-6)
    assert jnp.allclose(logits, r_logits, atol=2e-2, rtol=2e-2)

    print("KERNEL_OK")
</pallas_src>

<mosaic_0001>
module attributes {stable_mosaic.version = 11 : i64} {
  func.func @_mlp_policy_kernel(%arg0: i32, %arg1: memref<8x128xf32, #tpu.memory_space<vmem>>, %arg2: memref<128x256xbf16, #tpu.memory_space<vmem>>, %arg3: memref<1x256xf32, #tpu.memory_space<vmem>>, %arg4: memref<32x128xbf16, #tpu.memory_space<vmem>>, %arg5: memref<1x128xf32, #tpu.memory_space<vmem>>, %arg6: memref<128x128xbf16, #tpu.memory_space<vmem>>, %arg7: memref<1x128xf32, #tpu.memory_space<vmem>>, %arg8: memref<128x128xbf16, #tpu.memory_space<vmem>>, %arg9: memref<1x128xf32, #tpu.memory_space<vmem>>, %arg10: memref<8x128xbf16, #tpu.memory_space<vmem>>) attributes {dimension_semantics = [#tpu.dimension_semantics<parallel>], iteration_bounds = array<i64: 1>, scalar_prefetch = 0 : i64, scratch_operands = 0 : i64, tpu.core_type = #tpu.core_type<tc>, window_params = [{transform_indices = @transform_0, window_bounds = array<i64: 8, 128>}, {pipeline_mode = #tpu.pipeline_mode<synchronous>, transform_indices = @transform_1, window_bounds = array<i64: 128, 256>}, {pipeline_mode = #tpu.pipeline_mode<synchronous>, transform_indices = @transform_2, window_bounds = array<i64: 1, 256>}, {pipeline_mode = #tpu.pipeline_mode<synchronous>, transform_indices = @transform_3, window_bounds = array<i64: 32, 128>}, {pipeline_mode = #tpu.pipeline_mode<synchronous>, transform_indices = @transform_4, window_bounds = array<i64: 1, 128>}, {pipeline_mode = #tpu.pipeline_mode<synchronous>, transform_indices = @transform_5, window_bounds = array<i64: 128, 128>}, {pipeline_mode = #tpu.pipeline_mode<synchronous>, transform_indices = @transform_6, window_bounds = array<i64: 1, 128>}, {pipeline_mode = #tpu.pipeline_mode<synchronous>, transform_indices = @transform_7, window_bounds = array<i64: 128, 128>}, {pipeline_mode = #tpu.pipeline_mode<synchronous>, transform_indices = @transform_8, window_bounds = array<i64: 1, 128>}, {transform_indices = @transform_9, window_bounds = array<i64: 8, 128>}]} {
    %c0 = arith.constant 0 : index
    %c0_0 = arith.constant 0 : index
    %0 = vector.load %arg1[%c0, %c0_0] : memref<8x128xf32, #tpu.memory_space<vmem>>, vector<8x128xf32>
    %1 = arith.truncf %0 : vector<8x128xf32> to vector<8x128xbf16>
    %c0_1 = arith.constant 0 : index
    %c0_2 = arith.constant 0 : index
    %2 = vector.load %arg2[%c0_1, %c0_2] : memref<128x256xbf16, #tpu.memory_space<vmem>>, vector<128x256xbf16>
    %cst = arith.constant dense<0.000000e+00> : vector<8x256xf32>
    %3 = tpu.matmul %1, %2, %cst {dimension_numbers = #tpu.dot_dimension_numbers<[1], [0], [0], [1], [0, 0, 1, 1], [], []>} : vector<8x128xbf16>, vector<128x256xbf16>, vector<8x256xf32> -> vector<8x256xf32>
    %c0_3 = arith.constant 0 : index
    %c0_4 = arith.constant 0 : index
    %4 = vector.load %arg3[%c0_3, %c0_4] : memref<1x256xf32, #tpu.memory_space<vmem>>, vector<1x256xf32>
    %5 = vector.broadcast %4 : vector<1x256xf32> to vector<8x256xf32>
    %6 = arith.addf %3, %5 : vector<8x256xf32>
    %cst_5 = arith.constant 0.000000e+00 : f32
    %7 = vector.broadcast %cst_5 : f32 to vector<8x256xf32>
    %8 = arith.maximumf %6, %7 : vector<8x256xf32>
    %9 = vector.extract_strided_slice %8 {offsets = [0, 0], sizes = [8, 32], strides = [1, 1]} : vector<8x256xf32> to vector<8x32xf32>
    %10 = vector.extract_strided_slice %8 {offsets = [0, 32], sizes = [8, 32], strides = [1, 1]} : vector<8x256xf32> to vector<8x32xf32>
    %11 = arith.addf %9, %10 : vector<8x32xf32>
    %12 = vector.extract_strided_slice %8 {offsets = [0, 64], sizes = [8, 32], strides = [1, 1]} : vector<8x256xf32> to vector<8x32xf32>
    %13 = arith.addf %11, %12 : vector<8x32xf32>
    %14 = vector.extract_strided_slice %8 {offsets = [0, 96], sizes = [8, 32], strides = [1, 1]} : vector<8x256xf32> to vector<8x32xf32>
    %15 = arith.addf %13, %14 : vector<8x32xf32>
    %16 = vector.extract_strided_slice %8 {offsets = [0, 128], sizes = [8, 32], strides = [1, 1]} : vector<8x256xf32> to vector<8x32xf32>
    %17 = arith.addf %15, %16 : vector<8x32xf32>
    %18 = vector.extract_strided_slice %8 {offsets = [0, 160], sizes = [8, 32], strides = [1, 1]} : vector<8x256xf32> to vector<8x32xf32>
    %19 = arith.addf %17, %18 : vector<8x32xf32>
    %20 = vector.extract_strided_slice %8 {offsets = [0, 192], sizes = [8, 32], strides = [1, 1]} : vector<8x256xf32> to vector<8x32xf32>
    %21 = arith.addf %19, %20 : vector<8x32xf32>
    %22 = vector.extract_strided_slice %8 {offsets = [0, 224], sizes = [8, 32], strides = [1, 1]} : vector<8x256xf32> to vector<8x32xf32>
    %23 = arith.addf %21, %22 : vector<8x32xf32>
    %24 = arith.truncf %23 : vector<8x32xf32> to vector<8x32xbf16>
    %c0_6 = arith.constant 0 : index
    %c0_7 = arith.constant 0 : index
    %25 = vector.load %arg4[%c0_6, %c0_7] : memref<32x128xbf16, #tpu.memory_space<vmem>>, vector<32x128xbf16>
    %cst_8 = arith.constant dense<0.000000e+00> : vector<8x128xf32>
    %26 = tpu.matmul %24, %25, %cst_8 {dimension_numbers = #tpu.dot_dimension_numbers<[1], [0], [0], [1], [0, 0, 1, 1], [], []>} : vector<8x32xbf16>, vector<32x128xbf16>, vector<8x128xf32> -> vector<8x128xf32>
    %c0_9 = arith.constant 0 : index
    %c0_10 = arith.constant 0 : index
    %27 = vector.load %arg5[%c0_9, %c0_10] : memref<1x128xf32, #tpu.memory_space<vmem>>, vector<1x128xf32>
    %28 = vector.broadcast %27 : vector<1x128xf32> to vector<8x128xf32>
    %29 = arith.addf %26, %28 : vector<8x128xf32>
    %cst_11 = arith.constant 0.000000e+00 : f32
    %30 = vector.broadcast %cst_11 : f32 to vector<8x128xf32>
    %31 = arith.maximumf %29, %30 : vector<8x128xf32>
    %32 = arith.truncf %31 : vector<8x128xf32> to vector<8x128xbf16>
    %c0_12 = arith.constant 0 : index
    %c0_13 = arith.constant 0 : index
    %33 = vector.load %arg6[%c0_12, %c0_13] : memref<128x128xbf16, #tpu.memory_space<vmem>>, vector<128x128xbf16>
    %cst_14 = arith.constant dense<0.000000e+00> : vector<8x128xf32>
    %34 = tpu.matmul %32, %33, %cst_14 {dimension_numbers = #tpu.dot_dimension_numbers<[1], [0], [0], [1], [0, 0, 1, 1], [], []>} : vector<8x128xbf16>, vector<128x128xbf16>, vector<8x128xf32> -> vector<8x128xf32>
    %c0_15 = arith.constant 0 : index
    %c0_16 = arith.constant 0 : index
    %35 = vector.load %arg7[%c0_15, %c0_16] : memref<1x128xf32, #tpu.memory_space<vmem>>, vector<1x128xf32>
    %36 = vector.broadcast %35 : vector<1x128xf32> to vector<8x128xf32>
    %37 = arith.addf %34, %36 : vector<8x128xf32>
    %cst_17 = arith.constant 0.000000e+00 : f32
    %38 = vector.broadcast %cst_17 : f32 to vector<8x128xf32>
    %39 = arith.maximumf %37, %38 : vector<8x128xf32>
    %40 = arith.truncf %39 : vector<8x128xf32> to vector<8x128xbf16>
    %c0_18 = arith.constant 0 : index
    %c0_19 = arith.constant 0 : index
    %41 = vector.load %arg8[%c0_18, %c0_19] : memref<128x128xbf16, #tpu.memory_space<vmem>>, vector<128x128xbf16>
    %cst_20 = arith.constant dense<0.000000e+00> : vector<8x128xf32>
    %42 = tpu.matmul %40, %41, %cst_20 {dimension_numbers = #tpu.dot_dimension_numbers<[1], [0], [0], [1], [0, 0, 1, 1], [], []>} : vector<8x128xbf16>, vector<128x128xbf16>, vector<8x128xf32> -> vector<8x128xf32>
    %c0_21 = arith.constant 0 : index
    %c0_22 = arith.constant 0 : index
    %43 = vector.load %arg9[%c0_21, %c0_22] : memref<1x128xf32, #tpu.memory_space<vmem>>, vector<1x128xf32>
    %44 = vector.broadcast %43 : vector<1x128xf32> to vector<8x128xf32>
    %45 = arith.addf %42, %44 : vector<8x128xf32>
    %46 = arith.truncf %45 : vector<8x128xf32> to vector<8x128xbf16>
    %c0_23 = arith.constant 0 : index
    %c0_24 = arith.constant 0 : index
    %47 = vector.load %arg10[%c0_23, %c0_24] : memref<8x128xbf16, #tpu.memory_space<vmem>>, vector<8x128xbf16>
    tpu.vector_store %arg10[%c0_23, %c0_24], %46 {strides = array<i32>} : memref<8x128xbf16, #tpu.memory_space<vmem>>, vector<8x128xbf16>,
    return
  }
  func.func @transform_0(%arg0: i32) -> (i32, i32) {
    %c0_i32 = arith.constant 0 : i32
    %c0_i32_0 = arith.constant 0 : i32
    return %arg0, %c0_i32 : i32, i32
  }
  func.func @transform_1(%arg0: i32) -> (i32, i32) {
    %c0_i32 = arith.constant 0 : i32
    %c0_i32_0 = arith.constant 0 : i32
    %c0_i32_1 = arith.constant 0 : i32
    return %c0_i32, %c0_i32_0 : i32, i32
  }
  func.func @transform_2(%arg0: i32) -> (i32, i32) {
    %c0_i32 = arith.constant 0 : i32
    %c0_i32_0 = arith.constant 0 : i32
    %c0_i32_1 = arith.constant 0 : i32
    return %c0_i32, %c0_i32_0 : i32, i32
  }
  func.func @transform_3(%arg0: i32) -> (i32, i32) {
    %c0_i32 = arith.constant 0 : i32
    %c0_i32_0 = arith.constant 0 : i32
    %c0_i32_1 = arith.constant 0 : i32
    return %c0_i32, %c0_i32_0 : i32, i32
  }
  func.func @transform_4(%arg0: i32) -> (i32, i32) {
    %c0_i32 = arith.constant 0 : i32
    %c0_i32_0 = arith.constant 0 : i32
    %c0_i32_1 = arith.constant 0 : i32
    return %c0_i32, %c0_i32_0 : i32, i32
  }
  func.func @transform_5(%arg0: i32) -> (i32, i32) {
    %c0_i32 = arith.constant 0 : i32
    %c0_i32_0 = arith.constant 0 : i32
    %c0_i32_1 = arith.constant 0 : i32
    return %c0_i32, %c0_i32_0 : i32, i32
  }
  func.func @transform_6(%arg0: i32) -> (i32, i32) {
    %c0_i32 = arith.constant 0 : i32
    %c0_i32_0 = arith.constant 0 : i32
    %c0_i32_1 = arith.constant 0 : i32
    return %c0_i32, %c0_i32_0 : i32, i32
  }
  func.func @transform_7(%arg0: i32) -> (i32, i32) {
    %c0_i32 = arith.constant 0 : i32
    %c0_i32_0 = arith.constant 0 : i32
    %c0_i32_1 = arith.constant 0 : i32
    return %c0_i32, %c0_i32_0 : i32, i32
  }
  func.func @transform_8(%arg0: i32) -> (i32, i32) {
    %c0_i32 = arith.constant 0 : i32
    %c0_i32_0 = arith.constant 0 : i32
    %c0_i32_1 = arith.constant 0 : i32
    return %c0_i32, %c0_i32_0 : i32, i32
  }
  func.func @transform_9(%arg0: i32) -> (i32, i32) {
    %c0_i32 = arith.constant 0 : i32
    %c0_i32_0 = arith.constant 0 : i32
    return %arg0, %c0_i32 : i32, i32
  }
}

</mosaic_0001>

<bundles_post_ra>
// kernel: tpu_custom_call.1
= control target key start
LH: loop header
LB: loop body
LE: loop exit
PB: predicated region body
PF: predicated region fallthrough
CT: control target
= control target key end

     0   :  { %14 = vsyncpa [#allocation3], 0  ;;  %s975_s0 = inlined_call_operand.hbm [shape: f32[8,128], index: 0, kind: input, shape index: {}]   ;;  %s976_s1 = inlined_call_operand.hbm [shape: bf16[128,256], index: 1, kind: input, shape index: {}]   ;;  %s977_s2 = inlined_call_operand.hbm [shape: f32[1,256], index: 2, kind: input, shape index: {}]   ;;  %s978_s3 = inlined_call_operand.hbm [shape: bf16[32,128], index: 3, kind: input, shape index: {}]   ;;  %s979_s4 = inlined_call_operand.vmem [shape: f32[1,128], index: 4, kind: input, shape index: {}]   ;;  %s980_s5 = inlined_call_operand.hbm [shape: bf16[128,128], index: 5, kind: input, shape index: {}]   ;;  %s981_s6 = inlined_call_operand.vmem [shape: f32[1,128], index: 6, kind: input, shape index: {}]   ;;  %s982_s7 = inlined_call_operand.hbm [shape: bf16[128,128], index: 7, kind: input, shape index: {}]   ;;  %s983_s8 = inlined_call_operand.vmem [shape: f32[1,128], index: 8, kind: input, shape index: {}]   ;;  %s984_s9 = inlined_call_operand.hbm [shape: bf16[8,128], index: 9, kind: output, shape index: {}]  }
   0x1   :  { %15 = vsyncpa [#allocation6], 0 }
   0x2   :  { %16 = vsyncpa [#allocation9], 0 }
   0x3   :  { %17 = vsyncpa [#allocation12], 0  ;;  %s34_s11 = sshll.u32 %s976_s1, 4  ;;  %s35_s11 = int_to_ptr.hbm [resolvable:$true] %s34_s11 }
   0x4   :  { %18 = vsyncpa [#allocation4], 0  ;;  %s874_s12 = smov [#allocation5]   ;;  %s58_s16 = sshll.u32 %s978_s3, 4  ;;  %s59_s16 = int_to_ptr.hbm [resolvable:$true] %s58_s16 }
   0x5   :  { %s36_s13 = sshll.u32 %s874_s12, 4  ;;  %s875_s17 = smov 128   ;;  %s37_s13 = int_to_ptr.vmem [resolvable:$true] %s36_s13 }
   0x6   :  { %s876_s18 = smov 8   ;;  %s877_s19 = smov [#allocation8]  }
   0x7   :  { %42 = dma.hbm_to_vmem [thread:$0]  %s35_s11, 2048, %s37_s13, [#allocation6], %s875_s17, %s875_s17, %s876_s18  }
   0x8   :  { %s60_s20 = sshll.u32 %s877_s19, 4  ;;  %s878_s21 = smov 64   ;;  %s61_s20 = int_to_ptr.vmem [resolvable:$true] %s60_s20 }
   0x9   :  { %s879_s22 = smov 4   ;;  %s24_s24 = sshll.u32 %s975_s0, 4  ;;  %s25_s24 = int_to_ptr.hbm [resolvable:$true] %s24_s24 }
   0xa   :  { %66 = dma.hbm_to_vmem [thread:$0]  %s59_s16, 256, %s61_s20, [#allocation9], %s878_s21, %s878_s21, %s879_s22  }
   0xb   :  { %s880_s25 = smov [#allocation2]   ;;  %s48_s28 = sshll.u32 %s977_s2, 4  ;;  %s49_s28 = int_to_ptr.hbm [resolvable:$true] %s48_s28 }
   0xc   :  { %s26_s26 = sshll.u32 %s880_s25, 4  ;;  %s881_s29 = smov [#allocation7]   ;;  %s27_s26 = int_to_ptr.vmem [resolvable:$true] %s26_s26 }
   0xd   :  { %29 = dma.hbm_to_vmem [thread:$0]  %s25_s24, 128, %s27_s26, [#allocation3]  }
   0xe   :  { %s50_s30 = sshll.u32 %s881_s29, 4  ;;  %s73_s12 = sshll.u32 %s980_s5, 4  ;;  %s51_s30 = int_to_ptr.vmem [resolvable:$true] %s50_s30  ;;  %s74_s12 = int_to_ptr.hbm [resolvable:$true] %s73_s12 }
   0xf   :  { %53 = dma.hbm_to_vmem [thread:$0]  %s49_s28, 32, %s51_s30, [#allocation6]  }
  0x10   :  { %s88_s14 = sshll.u32 %s982_s7, 4  ;;  %s882_s15 = smov [#allocation10]   ;;  %s89_s14 = int_to_ptr.hbm [resolvable:$true] %s88_s14 }
  0x11   :  { %s75_s16 = sshll.u32 %s882_s15, 4  ;;  %s883_s2 = smov [#allocation11]   ;;  %s76_s16 = int_to_ptr.vmem [resolvable:$true] %s75_s16 }
  0x12   :  { %81 = dma.hbm_to_vmem [thread:$0]  %s74_s12, 1024, %s76_s16, [#allocation9], %s878_s21, %s878_s21, %s879_s22  }
  0x13   :  { %s90_s17 = sshll.u32 %s883_s2, 4  ;;  %s91_s17 = int_to_ptr.vmem [resolvable:$true] %s90_s17 }
  0x14   :  { %96 = dma.hbm_to_vmem [thread:$0]  %s89_s14, 1024, %s91_s17, [#allocation12], %s878_s21, %s878_s21, %s879_s22  }
  0x15   :  { %864 = dma.done.wait [#allocation3], 128  }
  0x16   :  { %865 = vsyncadd [#allocation3], 4294967168 }
  0x17   :  { %866 = dma.done.wait [#allocation6], 2080  }
  0x18   :  { %867 = vsyncadd [#allocation6], 4294965216 }
  0x19   :  { %868 = dma.done.wait [#allocation9], 1280  }
  0x1a   :  { %869 = vsyncadd [#allocation9], 4294966016 }
  0x1b   :  { %870 = dma.done.wait [#allocation12], 1024  }
  0x1c   :  { %871 = vsyncadd [#allocation12], 4294966272  ;;  %v567_v0 = vld [vmem:[#allocation5 + $0x70] sm:$0xf]  ;;  %v661_v1 = vld [vmem:[#allocation5 + $0x74] sm:$0xf0] }
  0x1d   :  { %v559_v2 = vld [vmem:[#allocation5 + $0x60] sm:$0xf]  ;;  %v568_v3 = vor.u32 %v661_v1, %v567_v0  ;;  %v659_v4 = vld [vmem:[#allocation5 + $0x64] sm:$0xf0]  ;;  %v660_v5 = vld [vmem:[#allocation5 + $0x74] sm:$0xf] }
  0x1e   :  { %v569_v6 = vld [vmem:[#allocation5 + $0x78] sm:$0xf0]  ;;  %v658_v8 = vld [vmem:[#allocation5 + $0x64] sm:$0xf]  ;;  %v560_v9 = vor.u32 %v659_v4, %v559_v2  ;;  %v561_v10 = vld [vmem:[#allocation5 + $0x68] sm:$0xf0] }
  0x1f   :  { %v572_v7 = vor.u32 %v660_v5, %v569_v6  ;;  %228 = vmatpush.bf16.msra.mxu0 %v568_v3  ;;  %v551_v11 = vld [vmem:[#allocation5 + $0x50] sm:$0xf]  ;;  %v657_v12 = vld [vmem:[#allocation5 + $0x54] sm:$0xf0]  ;;  %v564_v13 = vor.u32 %v658_v8, %v561_v10  ;;  %v656_v14 = vld [vmem:[#allocation5 + $0x54] sm:$0xf] }
  0x20   :  { %v553_v15 = vld [vmem:[#allocation5 + $0x58] sm:$0xf0]  ;;  %v552_v16 = vor.u32 %v657_v12, %v551_v11  ;;  %v543_v17 = vld [vmem:[#allocation5 + $0x40] sm:$0xf]  ;;  %v655_v18 = vld [vmem:[#allocation5 + $0x44] sm:$0xf0] }
  0x21   :  { %241 = vmatpush.bf16.msra.mxu1 %v572_v7  ;;  %v556_v19 = vor.u32 %v656_v14, %v553_v15  ;;  %v654_v20 = vld [vmem:[#allocation5 + $0x44] sm:$0xf]  ;;  %v545_v21 = vld [vmem:[#allocation5 + $0x48] sm:$0xf0]  ;;  %v544_v22 = vor.u32 %v655_v18, %v543_v17  ;;  %v535_v23 = vld [vmem:[#allocation5 + $0x30] sm:$0xf] }
  0x22   :  { %v653_v24 = vld [vmem:[#allocation5 + $0x34] sm:$0xf0]  ;;  %v548_v25 = vor.u32 %v654_v20, %v545_v21  ;;  %v652_v26 = vld [vmem:[#allocation5 + $0x34] sm:$0xf]  ;;  %v537_v27 = vld [vmem:[#allocation5 + $0x38] sm:$0xf0] }
  0x23   :  { %229 = vmatpush.bf16.msra.mxu0 %v560_v9  ;;  %v536_v28 = vor.u32 %v653_v24, %v535_v23  ;;  %v527_v29 = vld [vmem:[#allocation5 + $0x20] sm:$0xf]  ;;  %v651_v30 = vld [vmem:[#allocation5 + $0x24] sm:$0xf0]  ;;  %v540_v31 = vor.u32 %v652_v26, %v537_v27  ;;  %v650_v32 = vld [vmem:[#allocation5 + $0x24] sm:$0xf] }
  0x24   :  { %v529_v33 = vld [vmem:[#allocation5 + $0x28] sm:$0xf0]  ;;  %v528_v34 = vor.u32 %v651_v30, %v527_v29  ;;  %v519_v35 = vld [vmem:[#allocation5 + $0x10] sm:$0xf]  ;;  %v649_v36 = vld [vmem:[#allocation5 + $0x14] sm:$0xf0] }
  0x25   :  { %242 = vmatpush.bf16.msra.mxu1 %v564_v13  ;;  %v532_v37 = vor.u32 %v650_v32, %v529_v33  ;;  %v648_v38 = vld [vmem:[#allocation5 + $0x14] sm:$0xf]  ;;  %v521_v39 = vld [vmem:[#allocation5 + $0x18] sm:$0xf0]  ;;  %v520_v40 = vor.u32 %v649_v36, %v519_v35  ;;  %v511_v41 = vld [vmem:[#allocation5] sm:$0xf] }
  0x26   :  { %v647_v42 = vld [vmem:[#allocation5 + $0x4] sm:$0xf0]  ;;  %v524_v43 = vor.u32 %v648_v38, %v521_v39  ;;  %v646_v44 = vld [vmem:[#allocation5 + $0x4] sm:$0xf]  ;;  %v513_v45 = vld [vmem:[#allocation5 + $0x8] sm:$0xf0] }
  0x27   :  { %230 = vmatpush.bf16.msra.mxu0 %v552_v16  ;;  %v512_v46 = vor.u32 %v647_v42, %v511_v41  ;;  %v124_v47 = vld [vmem:[#allocation2] sm:$0xff]  ;;  %v516_v48 = vor.u32 %v646_v44, %v513_v45  ;;  %v142_v50 = vld [vmem:[#allocation7] sm:$0x3]  ;;  %s884_s5 = smov 32   ;;  %s885_s7 = smov 96   ;;  %v663_v61 = vld [vmem:[#allocation8 + $0x8] sm:$0xff] }
  0x28   :  { %v125_v49 = vpack.c.bf16 %v124_v47, %v124_v47  ;;  %v144_v51 = vperm.slane %v142_v50, 0  ;;  %v145_v52 = vperm.slane %v142_v50, 1  ;;  %314 = vmatpush.bf16.msra.mxu2 %v663_v61  ;;  %v662_v62 = vld [vmem:[#allocation8] sm:$0xff]  ;;  %v671_v63 = vld [vmem:[#allocation10 + $0x38] sm:$0xff]  ;;  %v669_v1 = vld [vmem:[#allocation10 + $0x28] sm:$0xff]  ;;  %vm304_vm0 = vcmask 261120  }
  0x29   :  { %243 = vmatpush.bf16.msra.mxu1 %v556_v19  ;;  %391 = vmatpush.bf16.msra.mxu3 %v671_v63  ;;  %v670_v0 = vld [vmem:[#allocation10 + $0x30] sm:$0xff]  ;;  %v668_v3 = vld [vmem:[#allocation10 + $0x20] sm:$0xff]  ;;  %v667_v5 = vld [vmem:[#allocation10 + $0x18] sm:$0xff]  ;;  %s886_s1 = smov [#allocation13]   ;;  %s496_s26 = sshll.u32 %s984_s9, 4  ;;  %s497_s26 = int_to_ptr.hbm [resolvable:$true] %s496_s26 }
  0x2a   :  { %v666_v10 = vld [vmem:[#allocation10 + $0x10] sm:$0xff]  ;;  %v665_v19 = vld [vmem:[#allocation10 + $0x8] sm:$0xff]  ;;  %v664_v20 = vld [vmem:[#allocation10] sm:$0xff]  ;;  %s494_s23 = sshll.u32 %s886_s1, 4  ;;  %s495_s23 = int_to_ptr.vmem [resolvable:$true] %s494_s23 }
  0x2b   :  { %231 = vmatpush.bf16.msra.mxu0 %v544_v22  ;;  %v679_v21 = vld [vmem:[#allocation11 + $0x38] sm:$0xff]  ;;  %v678_v22 = vld [vmem:[#allocation11 + $0x30] sm:$0xff]  ;;  %v677_v23 = vld [vmem:[#allocation11 + $0x28] sm:$0xff] }
  0x2c   :  { %315 = vmatpush.bf16.msra.mxu2 %v662_v62  ;;  %v676_v24 = vld [vmem:[#allocation11 + $0x20] sm:$0xff]  ;;  %v674_v26 = vld [vmem:[#allocation11 + $0x10] sm:$0xff]  ;;  %v673_v33 = vld [vmem:[#allocation11 + $0x8] sm:$0xff] }
  0x2d   :  { %244 = vmatpush.bf16.msra.mxu1 %v548_v25  ;;  %392 = vmatpush.bf16.msra.mxu3 %v670_v0  ;;  %v675_v25 = vld [vmem:[#allocation11 + $0x18] sm:$0xff]  ;;  %v693_v27 = vld [vmem:[%s979_s4] ss:$0 sm:$0xff] }
  0x2e   :  { %v694_v35 = vld [vmem:[%s981_s6] ss:$0 sm:$0xff] }
  0x2f   :  { %232 = vmatpush.bf16.msra.mxu0 %v536_v28  ;;  %v695_v41 = vld [vmem:[%s983_s8] ss:$0 sm:$0xff] }
  0x30   :  { %474 = vmatpush.bf16.msrb.mxu2 %v679_v21 }
  0x31   :  { %245 = vmatpush.bf16.msra.mxu1 %v540_v31  ;;  %393 = vmatpush.bf16.msra.mxu3 %v669_v1 }
  0x33   :  { %233 = vmatpush.bf16.msra.mxu0 %v528_v34  ;;  %v672_v34 = vld [vmem:[#allocation11] sm:$0xff] }
  0x34   :  { %475 = vmatpush.bf16.msrb.mxu2 %v678_v22 }
  0x35   :  { %246 = vmatpush.bf16.msra.mxu1 %v532_v37  ;;  %394 = vmatpush.bf16.msra.mxu3 %v668_v3 }
  0x37   :  { %234 = vmatpush.bf16.msra.mxu0 %v520_v40 }
  0x38   :  { %476 = vmatpush.bf16.msrb.mxu2 %v677_v23 }
  0x39   :  { %247 = vmatpush.bf16.msra.mxu1 %v524_v43  ;;  %395 = vmatpush.bf16.msra.mxu3 %v667_v5 }
  0x3b   :  { %235 = vmatpush.bf16.msra.mxu0 %v512_v46 }
  0x3c   :  { %477 = vmatpush.bf16.msrb.mxu2 %v676_v24 }
  0x3d   :  { %248 = vmatpush.bf16.msra.mxu1 %v516_v48  ;;  %396 = vmatpush.bf16.msra.mxu3 %v666_v10 }
  0x3e   :  { %236 = vmatmul.bf16.vlgmr.msra.gmra.mxu0 %v125_v49 }
  0x40   :  { %249 = vmatmul.bf16.vlgmr.msra.gmra.mxu1 %v125_v49  ;;  %478 = vmatpush.bf16.msrb.mxu2 %v675_v25 }
  0x41   :  { %397 = vmatpush.bf16.msra.mxu3 %v665_v19 }
  0x44   :  { %479 = vmatpush.bf16.msrb.mxu2 %v674_v26 }
  0x45   :  { %398 = vmatpush.bf16.msra.mxu3 %v664_v20 }
  0x48   :  { %480 = vmatpush.bf16.msrb.mxu2 %v673_v33 }
  0x4c   :  { %481 = vmatpush.bf16.msrb.mxu2 %v672_v34 }
  0xbb   :  { %v237_v53 = vpop.f32.mrf.mxu0 }
  0xbc   :  { %v238_v54 = vadd.f32 %v237_v53, %v144_v51 }
  0xbd   :  { %v250_v55 = vpop.f32.mrf.mxu1 }
  0xbe   :  { %v251_v56 = vadd.f32 %v250_v55, %v145_v52  ;;  %v254_v57 = vmax.f32 %v238_v54, 0.0 }
  0xc0   :  { %v255_v58 = vmax.f32 %v251_v56, 0.0  ;;  %265 = vrot.lane.b32.xlu1 %v254_v57, %s884_s5  ;;  %257 = vrot.lane.b32.xlu0 %v254_v57, %s885_s7 }
  0xc2   :  { %275 = vrot.lane.b32.xlu2 %v255_v58, %s878_s21 }
  0xc3   :  { %v239_v59 = vpop.f32.mrf.mxu0 }
  0xc5   :  { %v252_v60 = vpop.f32.mrf.mxu1 }
  0xc8   :  { %261 = vrot.lane.b32.xlu0 %v254_v57, %s878_s21  ;;  %271 = vrot.lane.b32.xlu1 %v255_v58, %s885_s7 }
  0xca   :  { %279 = vrot.lane.b32.xlu2 %v255_v58, %s884_s5 }
 0x11c   :  { %v276_v7 = vpop.permute.xlu2 %275 }
 0x124   :  { %v280_v16 = vpop.permute.xlu2 %279 }
 0x132   :  { %v258_v2 = vpop.permute.xlu0 %257  ;;  %v266_v4 = vpop.permute.xlu1 %265 }
 0x133   :  { %v260_v6 = vadd.f32 %v258_v2, %v254_v57 }
 0x13a   :  { %v262_v8 = vpop.permute.xlu0 %261  ;;  %v272_v12 = vpop.permute.xlu1 %271 }
 0x13b   :  { %v264_v9 = vadd.f32 %v262_v8, %v260_v6 }
 0x13d   :  { %v268_v11 = vadd.f32 %v266_v4, %v264_v9 }
 0x13f   :  { %v269_v13 = vadd.f32 %v268_v11, %v255_v58 }
 0x141   :  { %v274_v14 = vadd.f32 %v272_v12, %v269_v13 }
 0x143   :  { %v278_v15 = vadd.f32 %v276_v7, %v274_v14 }
 0x145   :  { %v282_v17 = vadd.f32 %v280_v16, %v278_v15 }
 0x147   :  { %v283_v18 = vpack.c.bf16 %v282_v17, %v282_v17 }
 0x149   :  { %581 = vmatmul.msk.bf16.vlgmr.msra.gmra.mxu2 %vm304_vm0, %v283_v18 }
 0x1cc   :  { %v317_v28 = vpop.f32.mrf.mxu2 }
 0x1cd   :  { %v318_v29 = vadd.f32 %v693_v27, %v317_v28 }
 0x1cf   :  { %v321_v30 = vmax.f32 %v318_v29, 0.0 }
 0x1d1   :  { %v322_v31 = vpack.c.bf16 %v321_v30, %v321_v30 }
 0x1d3   :  { %399 = vmatmul.bf16.vlgmr.msra.gmra.mxu3 %v322_v31 }
 0x1d4   :  { %v319_v32 = vpop.f32.mrf.mxu2 }
 0x256   :  { %v400_v36 = vpop.f32.mrf.mxu3 }
 0x257   :  { %v401_v37 = vadd.f32 %v694_v35, %v400_v36 }
 0x259   :  { %v404_v38 = vmax.f32 %v401_v37, 0.0 }
 0x25b   :  { %v405_v39 = vpack.c.bf16 %v404_v38, %v404_v38 }
 0x25d   :  { %482 = vmatmul.bf16.vlgmr.msrb.gmra.mxu2 %v405_v39 }
 0x25e   :  { %v402_v40 = vpop.f32.mrf.mxu3 }
 0x2e0   :  { %v483_v42 = vpop.f32.mrf.mxu2 }
 0x2e1   :  { %v484_v43 = vadd.f32 %v695_v41, %v483_v42 }
 0x2e3   :  { %v487_v44 = vpack.c.bf16 %v484_v43, %v484_v43 }
 0x2e5   :  { %488 = vst [vmem:[#allocation13] sm:$0xf] %v487_v44 }
 0x2e6   :  { %499 = dma.vmem_to_hbm [thread:$0]  %s495_s23, 64, %s497_s26, [#allocation4]  }
 0x2e8   :  { %v485_v45 = vpop.f32.mrf.mxu2 }
 0x2e9   :  { %872 = dma.done.wait [#allocation4], 64  }
 0x2ea   :  { %873 = vsyncadd [#allocation4], 4294967232 }
 0x2eb   :  { %504 = vsyncpa [#allocation3], 1 }
 0x2ec   :  { %505 = vsyncpa [#allocation6], 1 }
 0x2ed   :  { %506 = vsyncpa [#allocation9], 1 }
 0x2ee   :  { %507 = vsyncpa [#allocation12], 1 }
 0x2ef   :  { %508 = vsyncpa [#allocation4], 1 }

</bundles_post_ra>
